<compile_context>
chip_gen: v6e
topology: v6e:2x2x1
jax: 0.10.0
libtpu: 0.0.40
codegen_flags: <defaults>
</compile_context>

<pallas_src>
import functools

import jax
import jax.numpy as jnp
from jax import lax
from jax.experimental import pallas as pl
from jax.experimental.pallas import tpu as pltpu


# ---------------------------------------------------------------------------
# Fused single-pass kernel: mean -> MLP -> gate -> scale, one (C, T) slab per
# grid step.  Reads x once, writes out once.
# ---------------------------------------------------------------------------
def _fused_kernel(x_ref, w1_ref, b1_ref, w2_ref, b2_ref, o_ref, *, t_total):
    # x_ref: (1, C, T); w1: (Cs, C); b1: (Cs, 1); w2: (C, Cs); b2: (C, 1)
    x = x_ref[0].astype(jnp.float32)                               # (C, T)
    mean = jnp.sum(x, axis=1, keepdims=True) * (1.0 / t_total)     # (C, 1)
    h = jnp.dot(w1_ref[...], mean,
                preferred_element_type=jnp.float32) + b1_ref[...]  # (Cs, 1)
    h = jnp.maximum(h, 0.0)
    g = jnp.dot(w2_ref[...], h,
                preferred_element_type=jnp.float32) + b2_ref[...]  # (C, 1)
    g = jax.nn.sigmoid(g)
    o_ref[0] = (x * g).astype(o_ref.dtype)


# ---------------------------------------------------------------------------
# Tiled pass 1: per-channel sum over time, accumulated in the resident f32
# output block across the T-tile grid axis.  Partial last tile is masked
# in-kernel (no jnp.pad of x needed).
# ---------------------------------------------------------------------------
def _reduce_kernel(x_ref, sum_ref, *, tt, t_total):
    # x_ref: (1, C, tt) ; sum_ref: (1, C, 1) f32, resident across the t axis.
    t = pl.program_id(1)

    @pl.when(t == 0)
    def _():
        sum_ref[...] = jnp.zeros_like(sum_ref)

    x = x_ref[0].astype(jnp.float32)                        # (C, tt)
    if t_total % tt:  # static: only emit the mask when tiles can be partial
        idx = lax.broadcasted_iota(jnp.int32, x.shape, 1)
        x = jnp.where(t * tt + idx < t_total, x, 0.0)
    sum_ref[0] += jnp.sum(x, axis=1, keepdims=True)         # (C, 1)


# ---------------------------------------------------------------------------
# Tiled pass 2: broadcast-scale x by the per-(batch, channel) sigmoid gate.
# Out-of-bounds lanes of the edge tile are discarded by Pallas on store.
# ---------------------------------------------------------------------------
def _scale_kernel(x_ref, g_ref, o_ref):
    # x_ref: (1, C, tt) ; g_ref: (1, C, 1) f32 ; o_ref: (1, C, tt)
    o_ref[0] = (x_ref[0].astype(jnp.float32) * g_ref[0]).astype(o_ref.dtype)


def _choose_time_tile(T, C, itemsize, time_tile=None):
    """Lane-dense (multiple-of-128) time tile sized to ~2 MiB per (C, tt) block."""
    if time_tile is not None:
        assert time_tile % 128 == 0, "time_tile must be a multiple of 128"
        tt = time_tile
    else:
        target_elems = (2 * 1024 * 1024) // max(1, C * itemsize)
        tt = max(128, (target_elems // 128) * 128)
        tt = min(tt, 2048)
    # Never make the tile larger than the (128-rounded-up) time extent.
    tt = min(tt, pl.cdiv(T, 128) * 128)
    return tt


def se_connect(x, w1, b1, w2, b2, *, time_tile=None,
               max_fused_slab_bytes=8 * 1024 * 1024):
    """SE_Connect forward: x * sigmoid(L2(relu(L1(mean_T(x))))), x is (B, C, T)."""
    B, C, T = x.shape
    Cs = w1.shape[0]
    assert w1.shape == (Cs, C) and w2.shape == (C, Cs)
    itemsize = jnp.dtype(x.dtype).itemsize
    slab_bytes = C * T * itemsize

    w1f = w1.astype(jnp.float32)
    b1f = b1.astype(jnp.float32)
    w2f = w2.astype(jnp.float32)
    b2f = b2.astype(jnp.float32)

    # ---------------- fused single-pass path (minimum HBM traffic) ----------
    if slab_bytes <= max_fused_slab_bytes:
        vmem_limit = int(min(64 << 20, max(32 << 20, 4 * slab_bytes + (4 << 20))))
        return pl.pallas_call(
            functools.partial(_fused_kernel, t_total=T),
            out_shape=jax.ShapeDtypeStruct((B, C, T), x.dtype),
            grid_spec=pltpu.PrefetchScalarGridSpec(
                num_scalar_prefetch=0,
                grid=(B,),
                in_specs=[
                    pl.BlockSpec((1, C, T), lambda b: (b, 0, 0)),
                    pl.BlockSpec((Cs, C), lambda b: (0, 0)),
                    pl.BlockSpec((Cs, 1), lambda b: (0, 0)),
                    pl.BlockSpec((C, Cs), lambda b: (0, 0)),
                    pl.BlockSpec((C, 1), lambda b: (0, 0)),
                ],
                out_specs=pl.BlockSpec((1, C, T), lambda b: (b, 0, 0)),
            ),
            compiler_params=pltpu.CompilerParams(
                dimension_semantics=("parallel",),
                vmem_limit_bytes=vmem_limit),
            cost_estimate=pl.CostEstimate(
                flops=2 * B * C * T + 4 * B * C * Cs,
                transcendentals=B * C,
                bytes_accessed=2 * B * C * T * itemsize),
        )(x, w1f, b1f.reshape(Cs, 1), w2f, b2f.reshape(C, 1))

    # ---------------- tiled two-pass path (large C*T) ------------------------
    tt = _choose_time_tile(T, C, itemsize, time_tile)
    n_t = pl.cdiv(T, tt)
    block_bytes = C * tt * itemsize
    vmem_limit = int(min(64 << 20, max(32 << 20, 6 * block_bytes + (4 << 20))))

    # pass 1: channel sums over time
    sums = pl.pallas_call(
        functools.partial(_reduce_kernel, tt=tt, t_total=T),
        out_shape=jax.ShapeDtypeStruct((B, C, 1), jnp.float32),
        grid_spec=pltpu.PrefetchScalarGridSpec(
            num_scalar_prefetch=0,
            grid=(B, n_t),
            in_specs=[pl.BlockSpec((1, C, tt), lambda b, t: (b, 0, t))],
            out_specs=pl.BlockSpec((1, C, 1), lambda b, t: (b, 0, 0)),
        ),
        compiler_params=pltpu.CompilerParams(
            dimension_semantics=("parallel", "arbitrary"),
            vmem_limit_bytes=vmem_limit),
        cost_estimate=pl.CostEstimate(
            flops=B * C * T, transcendentals=0,
            bytes_accessed=B * C * T * itemsize + B * C * 4),
    )(x)

    # squeeze MLP (tiny, batched, plain JAX, f32)
    means = sums[:, :, 0] * jnp.float32(1.0 / T)                    # (B, C)
    h = jax.nn.relu(means @ w1f.T + b1f)                            # (B, Cs)
    gates = jax.nn.sigmoid(h @ w2f.T + b2f)[:, :, None]             # (B, C, 1) f32

    # pass 2: gate broadcast over time (writes (B, C, T) directly — no slice copy)
    out = pl.pallas_call(
        _scale_kernel,
        out_shape=jax.ShapeDtypeStruct((B, C, T), x.dtype),
        grid_spec=pltpu.PrefetchScalarGridSpec(
            num_scalar_prefetch=0,
            grid=(B, n_t),
            in_specs=[
                pl.BlockSpec((1, C, tt), lambda b, t: (b, 0, t)),
                pl.BlockSpec((1, C, 1), lambda b, t: (b, 0, 0)),
            ],
            out_specs=pl.BlockSpec((1, C, tt), lambda b, t: (b, 0, t)),
        ),
        compiler_params=pltpu.CompilerParams(
            dimension_semantics=("parallel", "parallel"),
            vmem_limit_bytes=vmem_limit),
        cost_estimate=pl.CostEstimate(
            flops=B * C * T, transcendentals=0,
            bytes_accessed=2 * B * C * T * itemsize + B * C * 4),
    )(x, gates)
    return out


def se_connect_ref(x, w1, b1, w2, b2):
    # Pure-JAX reference mirroring the PyTorch forward (f32 math).
    xf = x.astype(jnp.float32)
    out = xf.mean(axis=2)                                  # (B, C)
    out = jax.nn.relu(out @ w1.T + b1)                     # (B, C//s)
    out = jax.nn.sigmoid(out @ w2.T + b2)                  # (B, C)
    return (xf * out[:, :, None]).astype(x.dtype)


if __name__ == "__main__":
    B, C, s = 2, 16, 2
    Cs = C // s

    key = jax.random.PRNGKey(0)
    kx, kw1, kb1, kw2, kb2, kx2 = jax.random.split(key, 6)

    # PyTorch nn.Linear convention: weight (out, in), bias (out,)
    w1 = jax.random.normal(kw1, (Cs, C), dtype=jnp.float32) * 0.1
    b1 = jax.random.normal(kb1, (Cs,), dtype=jnp.float32) * 0.1
    w2 = jax.random.normal(kw2, (C, Cs), dtype=jnp.float32) * 0.1
    b2 = jax.random.normal(kb2, (C,), dtype=jnp.float32) * 0.1

    # Case 1: fused single-pass path (slab fits VMEM), T not a multiple of 128.
    # MXU-based in-kernel MLP uses default matmul precision -> 1e-3 tolerance.
    T1 = 40
    x1 = jax.random.normal(kx, (B, C, T1), dtype=jnp.float32)
    out1 = jax.block_until_ready(se_connect(x1, w1, b1, w2, b2))
    ref1 = se_connect_ref(x1, w1, b1, w2, b2)
    assert out1.shape == (B, C, T1)
    assert jnp.allclose(out1, ref1, atol=1e-3, rtol=1e-3), "mismatch (case 1)"

    # Case 2: tiled two-pass path (forced), T not a multiple of the tile,
    # exercising the in-kernel partial-tile mask and masked boundary stores.
    T2 = 300
    x2 = jax.random.normal(kx2, (B, C, T2), dtype=jnp.float32)
    out2 = jax.block_until_ready(
        se_connect(x2, w1, b1, w2, b2, time_tile=128, max_fused_slab_bytes=0))
    ref2 = se_connect_ref(x2, w1, b1, w2, b2)
    assert out2.shape == (B, C, T2)
    assert jnp.allclose(out2, ref2, atol=1e-5, rtol=1e-5), "mismatch (case 2)"

    print("KERNEL_OK")
</pallas_src>

<mosaic_0001>
module attributes {stable_mosaic.version = 11 : i64} {
  func.func @_fused_kernel(%arg0: i32, %arg1: memref<1x16x40xf32, #tpu.memory_space<vmem>>, %arg2: memref<8x16xf32, #tpu.memory_space<vmem>>, %arg3: memref<8x1xf32, #tpu.memory_space<vmem>>, %arg4: memref<16x8xf32, #tpu.memory_space<vmem>>, %arg5: memref<16x1xf32, #tpu.memory_space<vmem>>, %arg6: memref<1x16x40xf32, #tpu.memory_space<vmem>>) attributes {dimension_semantics = [#tpu.dimension_semantics<parallel>], iteration_bounds = array<i64: 2>, scalar_prefetch = 0 : i64, scratch_operands = 0 : i64, tpu.core_type = #tpu.core_type<tc>, window_params = [{transform_indices = @transform_0, window_bounds = array<i64: 1, 16, 40>}, {pipeline_mode = #tpu.pipeline_mode<synchronous>, transform_indices = @transform_1, window_bounds = array<i64: 8, 16>}, {pipeline_mode = #tpu.pipeline_mode<synchronous>, transform_indices = @transform_2, window_bounds = array<i64: 8, 1>}, {pipeline_mode = #tpu.pipeline_mode<synchronous>, transform_indices = @transform_3, window_bounds = array<i64: 16, 8>}, {pipeline_mode = #tpu.pipeline_mode<synchronous>, transform_indices = @transform_4, window_bounds = array<i64: 16, 1>}, {transform_indices = @transform_5, window_bounds = array<i64: 1, 16, 40>}]} {
    %c0 = arith.constant 0 : index
    %c0_0 = arith.constant 0 : index
    %c0_1 = arith.constant 0 : index
    %0 = vector.load %arg1[%c0, %c0_0, %c0_1] : memref<1x16x40xf32, #tpu.memory_space<vmem>>, vector<1x16x40xf32>
    %1 = vector.shape_cast %0 : vector<1x16x40xf32> to vector<16x40xf32>
    %cst = arith.constant dense<0.000000e+00> : vector<16xf32>
    %2 = vector.multi_reduction <add>, %1, %cst [1] : vector<16x40xf32> to vector<16xf32>
    %3 = vector.shape_cast %2 : vector<16xf32> to vector<16x1xf32>
    %cst_2 = arith.constant 2.500000e-02 : f32
    %4 = vector.broadcast %cst_2 : f32 to vector<16x1xf32>
    %5 = arith.mulf %3, %4 : vector<16x1xf32>
    %c0_3 = arith.constant 0 : index
    %c0_4 = arith.constant 0 : index
    %6 = vector.load %arg2[%c0_3, %c0_4] : memref<8x16xf32, #tpu.memory_space<vmem>>, vector<8x16xf32>
    %cst_5 = arith.constant dense<0.000000e+00> : vector<8x1xf32>
    %7 = tpu.matmul %6, %5, %cst_5 {dimension_numbers = #tpu.dot_dimension_numbers<[1], [0], [0], [1], [0, 0, 1, 1], [], []>} : vector<8x16xf32>, vector<16x1xf32>, vector<8x1xf32> -> vector<8x1xf32>
    %c0_6 = arith.constant 0 : index
    %c0_7 = arith.constant 0 : index
    %8 = vector.load %arg3[%c0_6, %c0_7] : memref<8x1xf32, #tpu.memory_space<vmem>>, vector<8x1xf32>
    %9 = arith.addf %7, %8 : vector<8x1xf32>
    %cst_8 = arith.constant 0.000000e+00 : f32
    %10 = vector.broadcast %cst_8 : f32 to vector<8x1xf32>
    %11 = arith.maximumf %9, %10 : vector<8x1xf32>
    %c0_9 = arith.constant 0 : index
    %c0_10 = arith.constant 0 : index
    %12 = vector.load %arg4[%c0_9, %c0_10] : memref<16x8xf32, #tpu.memory_space<vmem>>, vector<16x8xf32>
    %cst_11 = arith.constant dense<0.000000e+00> : vector<16x1xf32>
    %13 = tpu.matmul %12, %11, %cst_11 {dimension_numbers = #tpu.dot_dimension_numbers<[1], [0], [0], [1], [0, 0, 1, 1], [], []>} : vector<16x8xf32>, vector<8x1xf32>, vector<16x1xf32> -> vector<16x1xf32>
    %c0_12 = arith.constant 0 : index
    %c0_13 = arith.constant 0 : index
    %14 = vector.load %arg5[%c0_12, %c0_13] : memref<16x1xf32, #tpu.memory_space<vmem>>, vector<16x1xf32>
    %15 = arith.addf %13, %14 : vector<16x1xf32>
    %16 = arith.negf %15 : vector<16x1xf32>
    %17 = math.exp %16 : vector<16x1xf32>
    %cst_14 = arith.constant 1.000000e+00 : f32
    %18 = vector.broadcast %cst_14 : f32 to vector<16x1xf32>
    %19 = arith.addf %18, %17 : vector<16x1xf32>
    %20 = arith.divf %18, %19 : vector<16x1xf32>
    %21 = vector.broadcast %20 : vector<16x1xf32> to vector<16x40xf32>
    %22 = arith.mulf %1, %21 : vector<16x40xf32>
    %c0_15 = arith.constant 0 : index
    %c0_16 = arith.constant 0 : index
    %c0_17 = arith.constant 0 : index
    %23 = vector.load %arg6[%c0_15, %c0_16, %c0_17] : memref<1x16x40xf32, #tpu.memory_space<vmem>>, vector<1x16x40xf32>
    %24 = vector.shape_cast %23 : vector<1x16x40xf32> to vector<16x40xf32>
    %25 = vector.shape_cast %22 : vector<16x40xf32> to vector<1x16x40xf32>
    tpu.vector_store %arg6[%c0_15, %c0_16, %c0_17], %25 {strides = array<i32>} : memref<1x16x40xf32, #tpu.memory_space<vmem>>, vector<1x16x40xf32>,
    return
  }
  func.func @transform_0(%arg0: i32) -> (i32, i32, i32) {
    %c0_i32 = arith.constant 0 : i32
    %c0_i32_0 = arith.constant 0 : i32
    %c0_i32_1 = arith.constant 0 : i32
    return %arg0, %c0_i32, %c0_i32_0 : i32, i32, i32
  }
  func.func @transform_1(%arg0: i32) -> (i32, i32) {
    %c0_i32 = arith.constant 0 : i32
    %c0_i32_0 = arith.constant 0 : i32
    %c0_i32_1 = arith.constant 0 : i32
    return %c0_i32, %c0_i32_0 : i32, i32
  }
  func.func @transform_2(%arg0: i32) -> (i32, i32) {
    %c0_i32 = arith.constant 0 : i32
    %c0_i32_0 = arith.constant 0 : i32
    %c0_i32_1 = arith.constant 0 : i32
    return %c0_i32, %c0_i32_0 : i32, i32
  }
  func.func @transform_3(%arg0: i32) -> (i32, i32) {
    %c0_i32 = arith.constant 0 : i32
    %c0_i32_0 = arith.constant 0 : i32
    %c0_i32_1 = arith.constant 0 : i32
    return %c0_i32, %c0_i32_0 : i32, i32
  }
  func.func @transform_4(%arg0: i32) -> (i32, i32) {
    %c0_i32 = arith.constant 0 : i32
    %c0_i32_0 = arith.constant 0 : i32
    %c0_i32_1 = arith.constant 0 : i32
    return %c0_i32, %c0_i32_0 : i32, i32
  }
  func.func @transform_5(%arg0: i32) -> (i32, i32, i32) {
    %c0_i32 = arith.constant 0 : i32
    %c0_i32_0 = arith.constant 0 : i32
    %c0_i32_1 = arith.constant 0 : i32
    return %arg0, %c0_i32, %c0_i32_0 : i32, i32, i32
  }
}

</mosaic_0001>

<bundles_post_ra>
// kernel: tpu_custom_call.1
= control target key start
LH: loop header
LB: loop body
LE: loop exit
PB: predicated region body
PF: predicated region fallthrough
CT: control target
= control target key end

     0   :  { %10 = vsyncpa [#allocation3], 0  ;;  %s816_s0 = inlined_call_operand.vmem [shape: f32[2,16,40], index: 0, kind: input, shape index: {}]   ;;  %s817_s1 = inlined_call_operand.vmem [shape: f32[8,16], index: 1, kind: input, shape index: {}]   ;;  %s818_s2 = inlined_call_operand.vmem [shape: f32[8,1], index: 2, kind: input, shape index: {}]   ;;  %s819_s3 = inlined_call_operand.vmem [shape: f32[16,8], index: 3, kind: input, shape index: {}]   ;;  %s820_s4 = inlined_call_operand.vmem [shape: f32[16,1], index: 4, kind: input, shape index: {}]   ;;  %s821_s5 = inlined_call_operand.hbm [shape: f32[2,16,40], index: 5, kind: output, shape index: {}]  }
   0x1   :  { %12 = vsyncpa [#allocation3 + $0x1], 0  ;;  %s688_s18 = smov 0   ;;  %s690_s19 = smov 0  }
   0x2   :  { %s692_s20 = smov 0   ;;  %s694_s21 = smov 0  }
   0x3 LB: > { %s709_s22 = sadd.s32 4294967295, %s650_s21   ;;  %s499_s23 = sadd.s32 4294967294, %s650_s21   ;;  %s650_s21 = sphi %s694_s21, %s827_s21   ;;  %s646_s20 = sphi %s692_s20, %s826_s20   ;;  %s642_s19 = sphi %s690_s19, %s825_s19   ;;  %s638_s18 = sphi %s688_s18, %s824_s18  }
   0x4   : > { %s713_s24 = sadd.s32 1, %s650_s21   ;;  %s135_s25 = sadd.s32 1, %s646_s20 }
   0x5   : > { %s132_s26 = ssub.s32 %s650_s21, %s713_s24  ;;  %p145_p0 = scmp.ne.s32.totalorder %s646_s20, %s642_s19 }
   0x6   : > { %p133_p1 = scmp.eq.s32.totalorder %s132_s26, 0  ;;  %p146_p2 = scmp.eq.s32.totalorder %s709_s22, 1 }
   0x7   : > { %p151_p3 = scmp.ne.s32.totalorder %s642_s19, %s638_s18  ;;  %p152_p4 = scmp.eq.s32.totalorder %s499_s23, 1 }
   0x8   : > { %s724_s27 = scalar_select %p133_p1, %s646_s20, %s135_s25  }
   0x9   : > { %p726_p5 = por %p146_p2, %p145_p0  ;;  %p730_p6 = por %p152_p4, %p151_p3 }
   0xa   : > { %p502_p7 = scmp.ge.s32.totalorder %s650_s21, 1  ;;  %p190_p8 = scmp.lt.s32.totalorder %s650_s21, 3 }
   0xc   : > { %p191_p9 = pnand %p502_p7, %p190_p8 }
   0xd   : > { %p218_p10 = scmp.lt.s32.totalorder (!%p191_p9), %s709_s22, 1  ;;  %s517_s10 = sshll.u32 (!%p191_p9), %s709_s22, 8 }
   0xe   : > { %194 = sbr.rel (%p191_p9) target bundleno = 742 (0x2e6), region = 40  ;;  %s772_s13 = scalar_lea.hbm (!%p191_p9), %s821_s5, %s517_s10 }
   0xf   : > { %s655_s15 = smov (!%p191_p9), [#allocation2]  }
  0x10   : > { %s594_s16 = sshll.u32 (!%p191_p9), %s655_s15, 4  ;;  %s595_s16 = int_to_ptr.vmem [resolvable:$false] %s594_s16 }
  0x11   : > { %s596_s17 = scalar_lea.vmem (!%p191_p9), %s595_s16, 512 }
  0x13   : > { %s219_s30 = scalar_select %p218_p10, %s709_s22, 1  ;;  %vm225_vm0 = vcmask 326656   ;;  %v652_v4 = vmov 0.0   ;;  %vm653_vm1 = vmmov 0   ;;  %v234_v9 = vld [vmem:[%s817_s1] sm:$0xff]  ;;  %vm236_vm2 = vcmask 130048  }
  0x14   : > { %524 = vmatprep.subr.mxu0 %v652_v4  ;;  %528 = vmatprep.mubr.msk.f32.mxu0 %vm653_vm1, %v652_v4  ;;  %v311_v10 = vld [vmem:[%s819_s3] sm:$0xff]  ;;  %vm315_vm3 = vcmask 64512   ;;  %v312_v16 = vld [vmem:[%s819_s3 + $0x8] sm:$0xff]  ;;  %v654_v17 = vmov 0  }
  0x15   : > { %s516_s6 = sshll.u32 %s219_s30, 4  ;;  %533 = vmatprep.mubr.msk.f32.mxu1 %vm315_vm3, %v311_v10  ;;  %v235_v11 = vld [vmem:[%s818_s2] sm:$0xff]  ;;  %580 = vset.pattern.permute.xlu1 %v654_v17  ;;  %v314_v18 = vld [vmem:[%s820_s4 + $0x8] sm:$0xff] }
  0x16   : > { %s222_s9 = scalar_lea.vmem %s816_s0, %s516_s6  ;;  %581 = vset.pattern.permute.xlu0 %v654_v17  ;;  %v313_v20 = vld [vmem:[%s820_s4] sm:$0xff]  ;;  %s215_s6 = sand.u32 1, %s642_s19  }
  0x17   : > { %v741_v0 = vld [vmem:[%s222_s9 + $0x8] sm:$0xff]  ;;  %v223_v1 = vld [vmem:[%s222_s9] sm:$0xff]  ;;  %s503_s7 = sshll.u32 %s215_s6, 4  ;;  %s776_s14 = scalar_lea.sflag [#allocation3], %s215_s6 }
  0x18   : > { %v229_v2 = vsel %vm225_vm0, %v741_v0, 0.0  ;;  %v226_v3 = vsel %vm225_vm0, %v223_v1, 0.0  ;;  %s217_s8 = scalar_lea.vmem [#allocation2], %s503_s7 }
  0x19   : > { %230 = vadd.xlane.f32.xlu0 %v229_v2  ;;  %s437_s9 = sshll.u32 %s217_s8, 4  ;;  %s767_s9 = int_to_ptr.vmem [resolvable:$true] %s437_s9 }
  0x1a   : > { %s590_s22 = scalar_lea.vmem %s767_s9, 256  ;;  %p597_p0 = scmp.lt.s32.totalorder %s767_s9, %s595_s16 }
  0x1b   : > { %p591_p11 = scmp.ne.s32.totalorder %s767_s9, %s590_s22  ;;  %p598_p1 = scmp.lt.s32.totalorder %s596_s17, %s590_s22 }
  0x1d   : > { %227 = vadd.xlane.f32.xlu0 %v226_v3  ;;  %p592_p12 = pnand %p591_p11, %p726_p5  ;;  %p599_p2 = por %p598_p1, %p597_p0 }
  0x1f   : > { %p593_p13 = pneg %p592_p12 }
  0x21   : > { %p600_p3 = pnand %p599_p2, %p593_p13 }
  0xa2   : > { %v231_v5 = vpop.xlane.xlu0 %230 }
  0xa3   : > { %v233_v6 = vmul.f32 0.025, %v231_v5 }
  0xa5   : > { %525 = vmatpush3.msra.mxu0 %v233_v6 }
  0xa6   : > { %v228_v7 = vpop.xlane.xlu0 %227  ;;  %526 = vmatprep.subr.mxu0 %v652_v4 }
  0xa7   : > { %v232_v8 = vmul.f32 0.025, %v228_v7 }
  0xa9   : > { %527 = vmatpush3.msra.mxu0 %v232_v8 }
  0xaa   : > { %529 = vmatmul.mubr.msk.f32.vlgmr.msra.gmra.mxu0 %vm236_vm2, %v234_v9 }
 0x16a   : > { %v306_v12 = vpop.f32.mrf.mxu0 }
 0x16b   : > { %v307_v13 = vadd.f32 %v306_v12, %v235_v11 }
 0x16c   : > { %v530_v14 = vpop.f32.mrf.mxu0 }
 0x16d   : > { %v310_v15 = vmax.f32 %v307_v13, 0.0 }
 0x16f   : > { %531 = vmatprep.subr.mxu1 %v310_v15 }
 0x170   : > { %532 = vmatpush3.msra.mxu1 %v310_v15 }
 0x171   : > { %534 = vmatmul.mubr.msk.f32.vlgmr.msra.gmra.mxu1 %vm315_vm3, %v312_v16 }
 0x231   : > { %v535_v19 = vpop.f32.mrf.mxu1 }
 0x232   : > { %v394_v21 = vadd.f32 %v535_v19, %v314_v18 }
 0x233   : > { %v388_v22 = vpop.f32.mrf.mxu1 }
 0x234   : > { %v510_v23 = vmul.f32 -1.442695, %v394_v21  ;;  %v389_v24 = vadd.f32 %v388_v22, %v313_v20 }
 0x236   : > { %v509_v25 = vmul.f32 -1.442695, %v389_v24  ;;  %582 = vpow2.f32 %v510_v23 }
 0x238   : > { %584 = vpow2.f32 %v509_v25 }
 0x243   : > { %v583_v26 = vpop.eup %582 }
 0x244   : > { %v404_v29 = vadd.f32 1.0, %v583_v26 }
 0x245   : > { %v585_v27 = vpop.eup %584 }
 0x246   : > { %v403_v28 = vadd.f32 1.0, %v585_v27 }
 0x248   : > { %586 = vrcp.f32 %v403_v28 }
 0x249   : > { %588 = vrcp.f32 %v404_v29 }
 0x255   : > { %v587_v30 = vpop.eup %586 }
 0x256   : > { %411 = vperm.xlu1 %580, %v587_v30   ;;  %v589_v31 = vpop.eup %588 }
 0x25a   : > { %416 = vperm.xlu1 %580, %v589_v31  }
 0x2d1   : > { %v412_v32 = vpop.permute.xlu1 %411 }
 0x2d2   : > { %v419_v33 = vmul.f32 %v412_v32, %v223_v1 }
 0x2d4   : > { %421 = vst.msk [vmem:[%s217_s8] sm:$0xff] %vm225_vm0, %v419_v33 }
 0x2d5   : > { %v417_v34 = vpop.permute.xlu1 %416 }
 0x2d6   : > { %v420_v35 = vmul.f32 %v417_v34, %v741_v0 }
 0x2d8   : > { %422 = vst.msk [vmem:[%s217_s8 + $0x8] sm:$0xff] %vm225_vm0, %v420_v35 }
 0x2d9   : > { %603 = shalt.err (!%p600_p3)
}
 0x2da   : > { %s604_s23 = scalar_lea.hbm %s772_s13, 256  ;;  %s608_s30 = scalar_lea.hbm %s821_s5, 512 }
 0x2db   : > { %p605_p4 = scmp.ne.s32.totalorder %s772_s13, %s604_s23  ;;  %p609_p9 = scmp.lt.s32.totalorder %s772_s13, %s821_s5 }
 0x2dc   : > { %p610_p10 = scmp.lt.s32.totalorder %s608_s30, %s604_s23 }
 0x2dd   : > { %p606_p7 = pnand %p605_p4, %p726_p5 }
 0x2de   : > { %p611_p11 = por %p610_p10, %p609_p9 }
 0x2df   : > { %p607_p8 = pneg %p606_p7 }
 0x2e1   : > { %p612_p12 = pnand %p611_p11, %p607_p8 }
 0x2e3   : > { %615 = shalt.err (!%p612_p12)
}
 0x2e4   : > { %s656_s8 = smov 128   ;;  %s657_s10 = smov 8  }
 0x2e5   : > { %536 = dma.vmem_to_hbm [thread:$0]  (%p726_p5), %s767_s9, 256, %s772_s13, %s776_s14, %s656_s8, %s656_s8, %s657_s10  }
 0x2e6 PF: > { %p542_p13 = scmp.ge.s32.totalorder %s650_s21, 2  ;;  %s452_s11 = sand.u32 1, %s638_s18  }
 0x2e7   : > { %s453_s12 = scalar_lea.sflag [#allocation3], %s452_s11 }
 0x2e8   : > { %p539_p0 = pnand %p542_p13, %p730_p6 }
 0x2ea   : > { %p540_p1 = pneg %p539_p0 }
 0x2ec   : > { %633 = dma.done.wait (%p540_p1), %s453_s12, 256  }
 0x2ed   : > { %635 = vsyncadd (%p540_p1), %s453_s12, 4294967040  ;;  %p15_p2 = scmp.ge.s32.totalorder %s713_s24, 4   ;;  %s824_s18 = smov %s642_s19 }
 0x2ee   : > { %s825_s19 = smov %s646_s20  ;;  %s826_s20 = smov %s724_s27 }
 0x2ef   : > { %s827_s21 = smov %s713_s24  ;;  %17 = sbr.rel (!%p15_p2) target bundleno = 3 (0x3), region = 75 }
 0x2f4   :  { %458 = vsyncpa [#allocation3], 1 }
 0x2f5   :  { %460 = vsyncpa [#allocation3 + $0x1], 1 }

</bundles_post_ra>
